<compile_context>
chip_gen: v7x
topology: tpu7x:2x2x1
jax: 0.10.0
libtpu: 0.0.40
codegen_flags: <defaults>
</compile_context>

<pallas_src>
import functools

import jax
import jax.numpy as jnp
from jax.experimental import pallas as pl
from jax.experimental.pallas import tpu as pltpu


# ----------------------------- Pallas kernel -------------------------------

def _embed_kernel(p_ref, w_ref, pb_ref, o_ref):
    # p_ref  : (1, TN, K)  bf16 patch tile (one image, TN patches)
    # w_ref  : (K, D)      bf16 flattened conv weight (resident across grid)
    # pb_ref : (TN, D)     bf16 pos_embed + conv_bias (pre-folded)
    # o_ref  : (1, TN, D)  output tile
    acc = jnp.dot(p_ref[0], w_ref[...], preferred_element_type=jnp.float32)
    o_ref[0] = (acc + pb_ref[...].astype(jnp.float32)).astype(o_ref.dtype)


def siglip_vision_embeddings(pixel_values, conv_weight, conv_bias, pos_embed,
                             patch_size, *, tile_n=256, out_dtype=None):
    """pixel_values: [B, C, H, W] f32
       conv_weight : [D, C, P, P] f32 (PyTorch Conv2d layout)
       conv_bias   : [D] f32
       pos_embed   : [N, D] f32 (nn.Embedding weight), N = (H//P)*(W//P)
       returns     : [B, N, D] (out_dtype, default = dtype of pixel_values)
    """
    B, C, H, W = pixel_values.shape
    D = conv_weight.shape[0]
    P = patch_size
    Hp, Wp = H // P, W // P
    N = Hp * Wp
    K = C * P * P
    if out_dtype is None:
        out_dtype = pixel_values.dtype

    # --- glue: patch extraction (pure layout work, no compute) ---
    # [B, C, Hp, P, Wp, P] -> [B, Hp, Wp, C, P, P] -> [B, N, K]
    patches = pixel_values.reshape(B, C, Hp, P, Wp, P)
    patches = patches.transpose(0, 2, 4, 1, 3, 5).reshape(B, N, K)
    patches = patches.astype(jnp.bfloat16)

    # Flatten conv weight to [K, D], matching the (c, ph, pw) feature order.
    w_flat = conv_weight.reshape(D, K).T.astype(jnp.bfloat16)          # [K, D]
    # Fold the conv bias into the position table; keep it bf16 in HBM
    # (largest per-step input stream) and upcast inside the kernel epilogue.
    pos_plus_bias = (pos_embed.astype(jnp.float32)
                     + conv_bias.astype(jnp.float32)[None, :]
                     ).astype(jnp.bfloat16)                            # [N, D]

    # --- tiling: TN is a sublane multiple (8) unless it covers all of N.
    # The ragged last tile (when TN does not divide N) is handled by Pallas:
    # out-of-bounds rows read garbage but their output writes are dropped.
    TN = min(max(8, (tile_n // 8) * 8), N)
    n_tiles = pl.cdiv(N, TN)
    grid = (n_tiles, B)   # b innermost -> pos tile not re-DMA'd per image

    out_itemsize = jnp.dtype(out_dtype).itemsize
    cost = pl.CostEstimate(
        flops=2 * B * N * K * D,
        transcendentals=0,
        bytes_accessed=(patches.size * 2 + w_flat.size * 2
                        + pos_plus_bias.size * 2
                        + B * N * D * out_itemsize),
    )

    out = pl.pallas_call(
        _embed_kernel,
        out_shape=jax.ShapeDtypeStruct((B, N, D), out_dtype),
        grid_spec=pltpu.PrefetchScalarGridSpec(
            num_scalar_prefetch=0,
            grid=grid,
            in_specs=[
                # patch tile: new block each step -> pipelined
                pl.BlockSpec((1, TN, K), lambda n, b: (b, n, 0)),
                # weight: constant index_map -> fetched once, stays resident
                pl.BlockSpec((K, D), lambda n, b: (0, 0)),
                # pos + bias tile: varies only along n (outer axis)
                pl.BlockSpec((TN, D), lambda n, b: (n, 0)),
            ],
            out_specs=pl.BlockSpec((1, TN, D), lambda n, b: (b, n, 0)),
        ),
        compiler_params=pltpu.CompilerParams(
            dimension_semantics=("parallel", "parallel")),
        cost_estimate=cost,
    )(patches, w_flat, pos_plus_bias)

    return out


# ----------------------------- reference (plain JAX) ------------------------

def _reference(pixel_values, conv_weight, conv_bias, pos_embed, patch_size):
    B, C, H, W = pixel_values.shape
    D = conv_weight.shape[0]
    P = patch_size
    Hp, Wp = H // P, W // P
    N = Hp * Wp
    K = C * P * P
    patches = pixel_values.reshape(B, C, Hp, P, Wp, P)
    patches = patches.transpose(0, 2, 4, 1, 3, 5).reshape(B, N, K)
    w_flat = conv_weight.reshape(D, K).T
    return patches @ w_flat + conv_bias[None, None, :] + pos_embed[None, :, :]


# ----------------------------- main -----------------------------------------

if __name__ == "__main__":
    # Small config consistent with SigLipVisionConfig:
    #   hidden_size=32, num_channels=4, image_size=16, patch_size=4
    B, C, H, W = 2, 4, 16, 16
    P = 4
    D = 32
    N = (H // P) * (W // P)  # num_patches = num_positions = 16

    key = jax.random.PRNGKey(0)
    k_x, k_w, k_b, k_pos = jax.random.split(key, 4)

    pixel_values = jax.random.normal(k_x, (B, C, H, W), dtype=jnp.float32)
    conv_weight = jax.random.normal(k_w, (D, C, P, P), dtype=jnp.float32) * 0.02
    conv_bias = jax.random.normal(k_b, (D,), dtype=jnp.float32) * 0.02
    pos_embed = jax.random.normal(k_pos, (N, D), dtype=jnp.float32) * 0.02

    # tile_n=8 so the toy problem exercises the N-tiled multi-step grid
    # (grid = (2, 2)) and the resident-weight / reused-pos-tile paths.
    fn = jax.jit(functools.partial(siglip_vision_embeddings,
                                   patch_size=P, tile_n=8))
    out = jax.block_until_ready(fn(pixel_values, conv_weight, conv_bias,
                                   pos_embed))

    ref = _reference(pixel_values, conv_weight, conv_bias, pos_embed, P)
    assert out.shape == (B, N, D), out.shape
    max_err = float(jnp.max(jnp.abs(out - ref)))
    # bf16 inputs / pos table with f32 accumulation -> bf16-level tolerance.
    assert jnp.allclose(out, ref, atol=2e-2, rtol=2e-2), \
        f"mismatch vs reference, max|diff|={max_err}"

    print("KERNEL_OK")
</pallas_src>

<mosaic_0001>
module attributes {stable_mosaic.version = 11 : i64} {
  func.func @_embed_kernel(%arg0: i32, %arg1: i32, %arg2: memref<1x8x64xbf16, #tpu.memory_space<vmem>>, %arg3: memref<64x32xbf16, #tpu.memory_space<vmem>>, %arg4: memref<8x32xbf16, #tpu.memory_space<vmem>>, %arg5: memref<1x8x32xf32, #tpu.memory_space<vmem>>) attributes {dimension_semantics = [#tpu.dimension_semantics<parallel>, #tpu.dimension_semantics<parallel>], iteration_bounds = array<i64: 2, 2>, scalar_prefetch = 0 : i64, scratch_operands = 0 : i64, tpu.core_type = #tpu.core_type<tc>, window_params = [{transform_indices = @transform_0, window_bounds = array<i64: 1, 8, 64>}, {pipeline_mode = #tpu.pipeline_mode<synchronous>, transform_indices = @transform_1, window_bounds = array<i64: 64, 32>}, {transform_indices = @transform_2, window_bounds = array<i64: 8, 32>}, {transform_indices = @transform_3, window_bounds = array<i64: 1, 8, 32>}]} {
    %c0 = arith.constant 0 : index
    %c0_0 = arith.constant 0 : index
    %c0_1 = arith.constant 0 : index
    %0 = vector.load %arg2[%c0, %c0_0, %c0_1] : memref<1x8x64xbf16, #tpu.memory_space<vmem>>, vector<1x8x64xbf16>
    %1 = vector.shape_cast %0 : vector<1x8x64xbf16> to vector<8x64xbf16>
    %c0_2 = arith.constant 0 : index
    %c0_3 = arith.constant 0 : index
    %2 = vector.load %arg3[%c0_2, %c0_3] : memref<64x32xbf16, #tpu.memory_space<vmem>>, vector<64x32xbf16>
    %cst = arith.constant dense<0.000000e+00> : vector<8x32xf32>
    %3 = tpu.matmul %1, %2, %cst {dimension_numbers = #tpu.dot_dimension_numbers<[1], [0], [0], [1], [0, 0, 1, 1], [], []>} : vector<8x64xbf16>, vector<64x32xbf16>, vector<8x32xf32> -> vector<8x32xf32>
    %c0_4 = arith.constant 0 : index
    %c0_5 = arith.constant 0 : index
    %4 = vector.load %arg4[%c0_4, %c0_5] : memref<8x32xbf16, #tpu.memory_space<vmem>>, vector<8x32xbf16>
    %5 = arith.extf %4 : vector<8x32xbf16> to vector<8x32xf32>
    %6 = arith.addf %3, %5 : vector<8x32xf32>
    %c0_6 = arith.constant 0 : index
    %c0_7 = arith.constant 0 : index
    %c0_8 = arith.constant 0 : index
    %7 = vector.load %arg5[%c0_6, %c0_7, %c0_8] : memref<1x8x32xf32, #tpu.memory_space<vmem>>, vector<1x8x32xf32>
    %8 = vector.shape_cast %7 : vector<1x8x32xf32> to vector<8x32xf32>
    %9 = vector.shape_cast %6 : vector<8x32xf32> to vector<1x8x32xf32>
    tpu.vector_store %arg5[%c0_6, %c0_7, %c0_8], %9 {strides = array<i32>} : memref<1x8x32xf32, #tpu.memory_space<vmem>>, vector<1x8x32xf32>,
    return
  }
  func.func @transform_0(%arg0: i32, %arg1: i32) -> (i32, i32, i32) {
    %c0_i32 = arith.constant 0 : i32
    %c0_i32_0 = arith.constant 0 : i32
    return %arg1, %arg0, %c0_i32 : i32, i32, i32
  }
  func.func @transform_1(%arg0: i32, %arg1: i32) -> (i32, i32) {
    %c0_i32 = arith.constant 0 : i32
    %c0_i32_0 = arith.constant 0 : i32
    %c0_i32_1 = arith.constant 0 : i32
    return %c0_i32, %c0_i32_0 : i32, i32
  }
  func.func @transform_2(%arg0: i32, %arg1: i32) -> (i32, i32) {
    %c0_i32 = arith.constant 0 : i32
    %c0_i32_0 = arith.constant 0 : i32
    return %arg0, %c0_i32 : i32, i32
  }
  func.func @transform_3(%arg0: i32, %arg1: i32) -> (i32, i32, i32) {
    %c0_i32 = arith.constant 0 : i32
    %c0_i32_0 = arith.constant 0 : i32
    return %arg1, %arg0, %c0_i32 : i32, i32, i32
  }
}

</mosaic_0001>

<bundles_post_ra>
// kernel: siglip_vision_embeddings.1
= control target key start
LH: loop header
LB: loop body
LE: loop exit
PB: predicated region body
PF: predicated region fallthrough
CT: control target
= control target key end

     0   :  { %s783_s0 = inlined_call_operand.vmem [shape: bf16[2,16,64], index: 0, kind: input, shape index: {}]   ;;  %s784_s1 = inlined_call_operand.vmem [shape: bf16[64,32], index: 1, kind: input, shape index: {}]   ;;  %s785_s2 = inlined_call_operand.vmem [shape: bf16[16,32], index: 2, kind: input, shape index: {}]   ;;  %s786_s3 = inlined_call_operand.hbm [shape: f32[2,16,32], index: 3, kind: output, shape index: {}]  }
   0x1   :  { %787 = sst [smem:[#allocation5_spill]] %s784_s1 }
   0x2   :  { %8 = vsyncpa [#allocation3], 0 }
   0x3   :  { %10 = vsyncpa [#allocation3 + $0x1], 0  ;;  %s631_s12 = smov 0   ;;  %s633_s13 = smov 0  }
   0x4   :  { %s635_s14 = smov 0   ;;  %s637_s15 = smov 0  }
   0x5   :  { %s639_s16 = smov 0   ;;  %s641_s17 = smov 0  }
   0x6   :  { %s643_s18 = smov 0   ;;  %s645_s19 = smov 0  }
   0x7 LB: > { %s399_s20 = sadd.s32 4294967295, %s606_s19   ;;  %s400_s21 = sadd.s32 4294967294, %s606_s19   ;;  %s606_s19 = sphi %s645_s19, %s16_s19   ;;  %s602_s18 = sphi %s643_s18, %s797_s18   ;;  %s598_s17 = sphi %s641_s17, %s796_s17   ;;  %s594_s16 = sphi %s639_s16, %s795_s16   ;;  %s590_s15 = sphi %s637_s15, %s794_s15   ;;  %s586_s14 = sphi %s635_s14, %s793_s14   ;;  %s582_s13 = sphi %s633_s13, %s792_s13   ;;  %s578_s12 = sphi %s631_s12, %s791_s12  }
   0x8   : > { %s25_s22 = sadd.s32 1, %s598_s17  ;;  %s28_s23 = sadd.s32 1, %s602_s18 }
   0x9   : > { %p26_p0 = scmp.ge.s32.totalorder %s25_s22, 2  ;;  %p122_p1 = scmp.ne.s32.totalorder %s586_s14, %s582_s13 }
   0xa   : > { %p123_p2 = scmp.eq.s32.totalorder %s399_s20, 3  ;;  %p128_p5 = scmp.ne.s32.totalorder %s582_s13, %s578_s12 }
   0xb   : > { %s799_s22 = smov (%p26_p0, %s25_s22), 0  ;;  %s801_s23 = smov (!%p26_p0, %s28_s23), %s602_s18 }
   0xc   : > { %s107_s24 = ssub.s32 %s598_s17, %s799_s22  ;;  %p682_p3 = por %p123_p2, %p122_p1 }
   0xd   : > { %p30_p4 = scmp.ge.s32.totalorder %s801_s23, 2  ;;  %p129_p6 = scmp.eq.s32.totalorder %s400_s21, 3 }
   0xe   : > { %p403_p7 = scmp.ge.s32.totalorder %s606_s19, 1  ;;  %p168_p9 = scmp.lt.s32.totalorder %s606_s19, 5 }
   0xf   : > { %s803_s23 = smov (%p30_p4, %s801_s23), 0  ;;  %p691_p8 = por %p129_p6, %p128_p5 }
  0x10   : > { %s108_s27 = ssub.s32 %s602_s18, %s803_s23  ;;  %s112_s28 = sadd.s32 1, %s586_s14 }
  0x11   : > { %s109_s29 = sor.u32 %s108_s27, %s107_s24  ;;  %p169_p10 = pnand %p403_p7, %p168_p9 }
  0x12   : > { %p110_p11 = scmp.eq.s32.totalorder %s109_s29, 0  ;;  %s790_s1 = sld [smem:[#allocation5_spill]] (!%p169_p10)  ;;  %v608_v1 = vmov (!%p169_p10), 0.0   ;;  %vm609_vm0 = vmmov (!%p169_p10), 0   ;;  %vm247_vm1 = vcmask (!%p169_p10), 523264   ;;  %vm291_vm2 = vcmask (!%p169_p10), 261120  }
  0x13   : > { %172 = sbr.rel (%p169_p10) target bundleno = 268 (0x10c), region = 32  ;;  %423 = vmatprep.subr.bf16.mxu0 (!%p169_p10), %v608_v1  ;;  %431 = vmatprep.mubr.msk.bf16.mxu0 (!%p169_p10), %vm609_vm0, %v608_v1  ;;  %p199_p12 = scmp.lt.s32.totalorder (!%p169_p10), %s590_s15, 1 }
  0x14   : > { %s700_s30 = scalar_select %p110_p11, %s586_s14, %s112_s28  }
  0x15   : > { %p201_p13 = scmp.lt.s32.totalorder (!%p169_p10), %s594_s16, 1  ;;  %s196_s7 = sand.u32 (!%p169_p10), 1, %s582_s13  }
  0x18   : > { %v508_v0 = vld [vmem:[%s790_s1] sm:$0xff] (!%p169_p10)   ;;  %v509_v2 = vld [vmem:[%s790_s1 + $0x8] sm:$0xff] (!%p169_p10)   ;;  %v510_v3 = vld [vmem:[%s790_s1 + $0x10] sm:$0xff] (!%p169_p10)  }
  0x19   : > { %424 = vmatpush3.bf16.msra.mxu0 (!%p169_p10), %v508_v0  ;;  %v511_v4 = vld [vmem:[%s790_s1 + $0x18] sm:$0xff] (!%p169_p10)  }
  0x1a   : > { %425 = vmatprep.subr.bf16.mxu0 %v608_v1  ;;  %s200_s8 = scalar_select %p199_p12, %s590_s15, 1 }
  0x1b   : > { %s202_s9 = scalar_select %p201_p13, %s594_s16, 1 }
  0x1c   : > { %s405_s20 = sshll.u32 %s200_s8, 1 }
  0x1d   : > { %426 = vmatpush3.bf16.msra.mxu0 %v509_v2  ;;  %s204_s21 = sadd.s32 %s405_s20, %s202_s9  ;;  %s407_s6 = sshll.u32 %s202_s9, 2 }
  0x1e   : > { %427 = vmatprep.subr.bf16.mxu0 %v608_v1  ;;  %s406_s24 = sshll.u32 %s204_s21, 2  ;;  %s210_s11 = scalar_lea.vmem %s785_s2, %s407_s6 }
  0x1f   : > { %s206_s5 = scalar_lea.vmem %s783_s0, %s406_s24  ;;  %s404_s20 = sshll.u32 %s196_s7, 3  ;;  %v221_v6 = vld [vmem:[%s210_s11] sm:$0xf] }
  0x20   : > { %v212_v5 = vld [vmem:[%s206_s5] sm:$0xf]  ;;  %s414_s21 = sshll.u32 %s590_s15, 1  ;;  %v222_v7 = vunpack.c.l.bf16 %v221_v6  ;;  %s198_s1 = scalar_lea.vmem [#allocation2], %s404_s20 }
  0x21   : > { %428 = vmatpush3.bf16.msra.mxu0 %v510_v3  ;;  %s305_s27 = sadd.s32 %s594_s16, %s414_s21  ;;  %s309_s29 = sshll.u32 %s198_s1, 4  ;;  %s732_s29 = int_to_ptr.vmem [resolvable:$true] %s309_s29 }
  0x22   : > { %429 = vmatprep.subr.bf16.mxu0 %v608_v1  ;;  %s415_s28 = sshll.u32 %s305_s27, 7  ;;  %s294_s15 = scalar_lea.sflag [#allocation3], %s196_s7 }
  0x23   : > { %s730_s4 = scalar_lea.hbm %s786_s3, %s415_s28  ;;  %s512_s16 = scalar_lea.vmem %s732_s29, 128 }
  0x24   : > { %p513_p0 = scmp.ne.s32.totalorder %s732_s29, %s512_s16  ;;  %s610_s5 = smov [#allocation2]  }
  0x25   : > { %430 = vmatpush3.bf16.msra.mxu0 %v511_v4  ;;  %s516_s6 = sshll.u32 %s610_s5, 4  ;;  %s517_s6 = int_to_ptr.vmem [resolvable:$false] %s516_s6 }
  0x26   : > { %p514_p1 = pnand %p513_p0, %p682_p3  ;;  %s518_s8 = scalar_lea.vmem %s517_s6, 256 }
  0x27   : > { %p519_p4 = scmp.lt.s32.totalorder %s732_s29, %s517_s6  ;;  %p520_p5 = scmp.lt.s32.totalorder %s518_s8, %s512_s16 }
  0x28   : > { %432 = vmatmul.mubr.msk.bf16.vlgmr.msra.gmra.mrb[0].mxu0 %vm247_vm1, %v212_v5  ;;  %p515_p2 = pneg %p514_p1 }
  0x29   : > { %p521_p6 = por %p520_p5, %p519_p4 }
  0x2b   : > { %p522_p7 = pnand %p521_p6, %p515_p2 }
  0xfb   : > { %v285_v8 = vpop.f32.mrb[0].mxu0 }
  0xfc   : > { %v286_v9 = vadd.f32 %v285_v8, %v222_v7  ;;  %v433_v10 = vpop.f32.mrb[1].mxu0 }
  0xfd   : > { %v288_v11 = vpop.f32.mrb[2].mxu0 }
  0xfe   : > { %v434_v12 = vpop.f32.mrb[3].mxu0  ;;  %292 = vst.msk [vmem:[%s198_s1] sm:$0xff] %vm291_vm2, %v286_v9 }
  0xff   : > { %525 = shalt.err (!%p522_p7)
}
 0x100   : > { %s526_s1 = scalar_lea.hbm %s730_s4, 128  ;;  %s530_s11 = scalar_lea.hbm %s786_s3, 512 }
 0x101   : > { %p527_p9 = scmp.ne.s32.totalorder %s730_s4, %s526_s1  ;;  %p531_p12 = scmp.lt.u32.totalorder %s730_s4, %s786_s3 }
 0x102   : > { %p532_p13 = scmp.lt.u32.totalorder %s530_s11, %s526_s1  ;;  %p534_p1 = scmp.lt.u32.totalorder %s526_s1, %s730_s4 }
 0x103   : > { %p528_p10 = pnand %p527_p9, %p682_p3 }
 0x104   : > { %p533_p0 = por %p532_p13, %p531_p12 }
 0x105   : > { %p529_p11 = pneg %p528_p10 }
 0x106   : > { %p535_p2 = por %p534_p1, %p533_p0 }
 0x108   : > { %p536_p4 = pnand %p535_p2, %p529_p11 }
 0x10a   : > { %539 = shalt.err (!%p536_p4)
}
 0x10b   : > { %435 = dma.vmem_to_hbm [thread:$0]  (%p682_p3), %s732_s29, 128, %s730_s4, %s294_s15  }
 0x10c PF: > { %p441_p5 = scmp.ge.s32.totalorder %s606_s19, 2  ;;  %s321_s27 = sand.u32 1, %s578_s12  }
 0x10d   : > { %s322_s28 = scalar_lea.sflag [#allocation3], %s321_s27 }
 0x10e   : > { %p438_p6 = pnand %p441_p5, %p691_p8 }
 0x110   : > { %573 = dma.done.wait (!%p438_p6), %s322_s28, 128  }
 0x111   : > { %575 = vsyncadd (!%p438_p6), %s322_s28, 4294967168  ;;  %s16_s19 = sadd.s32 1, %s606_s19   ;;  %s791_s12 = smov %s582_s13 }
 0x112   : > { %p13_p7 = scmp.ge.s32.totalorder %s16_s19, 6   ;;  %s792_s13 = smov %s586_s14 }
 0x113   : > { %s793_s14 = smov %s700_s30  ;;  %s794_s15 = smov %s598_s17 }
 0x114   : > { %s795_s16 = smov %s602_s18  ;;  %s796_s17 = smov %s799_s22 }
 0x115   : > { %s797_s18 = smov %s803_s23  ;;  %15 = sbr.rel (!%p13_p7) target bundleno = 7 (0x7), region = 70 }
 0x11c   :  { %327 = vsyncpa [#allocation3], 1 }
 0x11d   :  { %329 = vsyncpa [#allocation3 + $0x1], 1 }

</bundles_post_ra>
